<compile_context>
chip_gen: v7x
topology: tpu7x:2x2x1
jax: 0.10.0
libtpu: 0.0.40
codegen_flags: <defaults>
</compile_context>

<pallas_src>
import functools

import jax
import jax.numpy as jnp
from jax.experimental import pallas as pl
from jax.experimental.pallas import tpu as pltpu


def _sparse_sum_pool_kernel(bidx_ref, h_ref, out_ref, acc_ref, *, n_nodes, mask_last):
    # bidx_ref: (1, TN) int32 (lane-dense), h_ref: (TN, TF), out_ref: (G, TF),
    # acc_ref: (G, TF) f32 scratch accumulator (resident across the node axis).
    ni = pl.program_id(1)
    tn, _ = h_ref.shape
    g = out_ref.shape[0]

    @pl.when(ni == 0)
    def _():
        acc_ref[...] = jnp.zeros_like(acc_ref)

    bidx = bidx_ref[...]                                        # (1, TN)
    h = h_ref[...]                                              # (TN, TF)

    if mask_last:
        # Zero out-of-range rows of the (possibly partial) last H tile so that
        # garbage in the out-of-bounds part of the block (e.g. NaN bit
        # patterns) can never leak into the accumulator.  The padded
        # batch-index lanes (== num_graphs) already yield all-zero one-hot
        # columns, so this is the only masking needed.
        row_ids = ni * tn + jax.lax.broadcasted_iota(jnp.int32, (tn, 1), 0)
        h = jnp.where(row_ids < n_nodes, h, jnp.zeros_like(h))

    # one_hot[g, i] = 1 iff batch_idx[i] == g, built directly in (G, TN) layout
    # (transpose-free) and in H's dtype (exactly representable in bf16/f32).
    graph_ids = jax.lax.broadcasted_iota(jnp.int32, (g, tn), 0)  # (G, TN)
    one_hot = (bidx == graph_ids).astype(h.dtype)                # (G, TN)

    # Segment-sum via the MXU: (G, TN) @ (TN, TF) -> (G, TF), f32 accumulation.
    acc_ref[...] += jnp.dot(one_hot, h, preferred_element_type=jnp.float32)

    @pl.when(ni == pl.num_programs(1) - 1)
    def _():
        out_ref[...] = acc_ref[...].astype(out_ref.dtype)


def _pick_feature_tile(F, target):
    """Largest multiple of 128 that divides F and is <= target; else the full F."""
    if F <= target or F % 128 != 0:
        return F
    best = F
    d = 128
    while d <= target:
        if F % d == 0:
            best = d
        d += 128
    return best


@functools.partial(
    jax.jit, static_argnames=("num_graphs", "node_tile", "feature_tile")
)
def sparse_sum_pooling(H, batch_idx, *, num_graphs, node_tile=512, feature_tile=512):
    """Pallas equivalent of torch_scatter.scatter(H, batch_idx, dim=0, reduce='sum')."""
    N, F = H.shape
    out_dtype = H.dtype

    # ---- tile selection ---------------------------------------------------
    # Node tile: multiple of 128 keeps both the (tn, tf) H block (sublanes) and
    # the (1, tn) batch-index block (lanes) aligned; small N uses a single tile.
    if N <= node_tile:
        tn = N
    else:
        tn = max(128, (node_tile // 128) * 128)
    num_node_steps = pl.cdiv(N, tn)
    Np = num_node_steps * tn
    mask_last = Np != N

    # Feature tile: a multiple of 128 dividing F (or the full F), so the output
    # block stays lane-dense and there are no partial F tiles.
    tf = _pick_feature_tile(F, feature_tile)
    num_f_steps = F // tf

    # ---- host-side prep (only the tiny int32 index row is padded; H is not) --
    bidx = batch_idx.astype(jnp.int32)
    if mask_last:
        bidx = jnp.concatenate(
            [bidx, jnp.full((Np - N,), num_graphs, jnp.int32)], axis=0
        )
    bidx_row = bidx.reshape(1, Np)

    # ---- VMEM budget: raise the scoped limit for large tiles (v7x-safe cap) --
    itemsize = jnp.dtype(H.dtype).itemsize
    est = (
        2 * tn * tf * itemsize            # double-buffered H tiles
        + 2 * tn * 4                      # double-buffered batch-index row tile
        + num_graphs * tf * 4             # f32 accumulator scratch
        + 2 * num_graphs * tf * itemsize  # double-buffered output block
    )
    vmem_limit = int(min(max(2 * est + (8 << 20), 32 << 20), 60 << 20))

    kernel = functools.partial(
        _sparse_sum_pool_kernel, n_nodes=N, mask_last=mask_last
    )

    return pl.pallas_call(
        kernel,
        out_shape=jax.ShapeDtypeStruct((num_graphs, F), out_dtype),
        grid_spec=pltpu.PrefetchScalarGridSpec(
            num_scalar_prefetch=0,
            grid=(num_f_steps, num_node_steps),
            in_specs=[
                pl.BlockSpec((1, tn), lambda fi, ni: (0, ni)),    # batch_idx row tile
                pl.BlockSpec((tn, tf), lambda fi, ni: (ni, fi)),  # H tile
            ],
            out_specs=pl.BlockSpec((num_graphs, tf), lambda fi, ni: (0, fi)),
            scratch_shapes=[pltpu.VMEM((num_graphs, tf), jnp.float32)],
        ),
        compiler_params=pltpu.CompilerParams(
            dimension_semantics=("parallel", "arbitrary"),
            vmem_limit_bytes=vmem_limit,
        ),
    )(bidx_row, H)


def _reference(H, batch_idx, num_graphs):
    # Pure-JAX reference of torch_scatter.scatter(..., dim=0, reduce='sum').
    return jax.ops.segment_sum(H, batch_idx, num_segments=num_graphs)


if __name__ == "__main__":
    key = jax.random.PRNGKey(0)
    k1, k2, k3, k4 = jax.random.split(key, 4)

    # --- Small merged-graph example: 16 nodes, 32 features, 3 graphs ---------
    N, F, G = 16, 32, 3
    H = jax.random.normal(k1, (N, F), dtype=jnp.float32)
    batch_idx = jnp.sort(jax.random.randint(k2, (N,), 0, G)).astype(jnp.int32)

    out = sparse_sum_pooling(H, batch_idx, num_graphs=G)
    out = jax.block_until_ready(out)
    ref = _reference(H, batch_idx, G)
    assert out.shape == (G, F), out.shape
    assert jnp.allclose(out, ref, atol=1e-5, rtol=1e-5), "mismatch vs reference (small)"

    # --- Tiled / masked path: ragged node count, multi-tile grid --------------
    N2, F2, G2 = 300, 256, 5
    H2 = jax.random.normal(k3, (N2, F2), dtype=jnp.float32)
    batch_idx2 = jnp.sort(jax.random.randint(k4, (N2,), 0, G2)).astype(jnp.int32)

    out2 = sparse_sum_pooling(
        H2, batch_idx2, num_graphs=G2, node_tile=128, feature_tile=128
    )
    out2 = jax.block_until_ready(out2)
    ref2 = _reference(H2, batch_idx2, G2)
    assert out2.shape == (G2, F2), out2.shape
    assert jnp.allclose(out2, ref2, atol=1e-4, rtol=1e-4), "mismatch vs reference (tiled)"

    print("KERNEL_OK")
</pallas_src>

<mosaic_0001>
module attributes {stable_mosaic.version = 11 : i64} {
  func.func @_sparse_sum_pool_kernel(%arg0: i32, %arg1: i32, %arg2: memref<1x16xi32, #tpu.memory_space<vmem>>, %arg3: memref<16x32xf32, #tpu.memory_space<vmem>>, %arg4: memref<3x32xf32, #tpu.memory_space<vmem>>, %arg5: memref<3x32xf32, #tpu.memory_space<vmem>>) attributes {dimension_semantics = [#tpu.dimension_semantics<parallel>, #tpu.dimension_semantics<arbitrary>], iteration_bounds = array<i64: 1, 1>, scalar_prefetch = 0 : i64, scratch_operands = 1 : i64, tpu.core_type = #tpu.core_type<tc>, window_params = [{transform_indices = @transform_0, window_bounds = array<i64: 1, 16>}, {transform_indices = @transform_1, window_bounds = array<i64: 16, 32>}, {transform_indices = @transform_2, window_bounds = array<i64: 3, 32>}]} {
    %c0_i32 = arith.constant 0 : i32
    %0 = arith.cmpi eq, %arg1, %c0_i32 : i32
    %1 = arith.extui %0 : i1 to i32
    %c0_i32_0 = arith.constant 0 : i32
    %2 = arith.cmpi ne, %1, %c0_i32_0 : i32
    scf.if %2 {
      %cst_10 = arith.constant 0.000000e+00 : f32
      %17 = vector.broadcast %cst_10 : f32 to vector<3x32xf32>
      %c0_11 = arith.constant 0 : index
      %c0_12 = arith.constant 0 : index
      %18 = vector.load %arg5[%c0_11, %c0_12] : memref<3x32xf32, #tpu.memory_space<vmem>>, vector<3x32xf32>
      tpu.vector_store %arg5[%c0_11, %c0_12], %17 {strides = array<i32>} : memref<3x32xf32, #tpu.memory_space<vmem>>, vector<3x32xf32>,
    } else {
    }
    %c0 = arith.constant 0 : index
    %c0_1 = arith.constant 0 : index
    %3 = vector.load %arg2[%c0, %c0_1] : memref<1x16xi32, #tpu.memory_space<vmem>>, vector<1x16xi32>
    %c0_2 = arith.constant 0 : index
    %c0_3 = arith.constant 0 : index
    %4 = vector.load %arg3[%c0_2, %c0_3] : memref<16x32xf32, #tpu.memory_space<vmem>>, vector<16x32xf32>
    %5 = tpu.iota {dimensions = array<i32: 0>} : vector<3x16xi32>
    %6 = vector.broadcast %3 : vector<1x16xi32> to vector<3x16xi32>
    %7 = arith.cmpi eq, %6, %5 : vector<3x16xi32>
    %8 = arith.extui %7 : vector<3x16xi1> to vector<3x16xi32>
    %9 = arith.sitofp %8 : vector<3x16xi32> to vector<3x16xf32>
    %c0_4 = arith.constant 0 : index
    %c0_5 = arith.constant 0 : index
    %10 = vector.load %arg5[%c0_4, %c0_5] : memref<3x32xf32, #tpu.memory_space<vmem>>, vector<3x32xf32>
    %cst = arith.constant dense<0.000000e+00> : vector<3x32xf32>
    %11 = tpu.matmul %9, %4, %cst {dimension_numbers = #tpu.dot_dimension_numbers<[1], [0], [0], [1], [0, 0, 1, 1], [], []>} : vector<3x16xf32>, vector<16x32xf32>, vector<3x32xf32> -> vector<3x32xf32>
    %12 = arith.addf %10, %11 : vector<3x32xf32>
    %c0_6 = arith.constant 0 : index
    %c0_7 = arith.constant 0 : index
    %13 = vector.load %arg5[%c0_6, %c0_7] : memref<3x32xf32, #tpu.memory_space<vmem>>, vector<3x32xf32>
    tpu.vector_store %arg5[%c0_6, %c0_7], %12 {strides = array<i32>} : memref<3x32xf32, #tpu.memory_space<vmem>>, vector<3x32xf32>,
    %c0_i32_8 = arith.constant 0 : i32
    %14 = arith.cmpi eq, %arg1, %c0_i32_8 : i32
    %15 = arith.extui %14 : i1 to i32
    %c0_i32_9 = arith.constant 0 : i32
    %16 = arith.cmpi ne, %15, %c0_i32_9 : i32
    scf.if %16 {
      %c0_10 = arith.constant 0 : index
      %c0_11 = arith.constant 0 : index
      %17 = vector.load %arg5[%c0_10, %c0_11] : memref<3x32xf32, #tpu.memory_space<vmem>>, vector<3x32xf32>
      %c0_12 = arith.constant 0 : index
      %c0_13 = arith.constant 0 : index
      %18 = vector.load %arg4[%c0_12, %c0_13] : memref<3x32xf32, #tpu.memory_space<vmem>>, vector<3x32xf32>
      tpu.vector_store %arg4[%c0_12, %c0_13], %17 {strides = array<i32>} : memref<3x32xf32, #tpu.memory_space<vmem>>, vector<3x32xf32>,
    } else {
    }
    return
  }
  func.func @transform_0(%arg0: i32, %arg1: i32) -> (i32, i32) {
    %c0_i32 = arith.constant 0 : i32
    %c0_i32_0 = arith.constant 0 : i32
    return %c0_i32, %arg1 : i32, i32
  }
  func.func @transform_1(%arg0: i32, %arg1: i32) -> (i32, i32) {
    %c0_i32 = arith.constant 0 : i32
    return %arg1, %arg0 : i32, i32
  }
  func.func @transform_2(%arg0: i32, %arg1: i32) -> (i32, i32) {
    %c0_i32 = arith.constant 0 : i32
    %c0_i32_0 = arith.constant 0 : i32
    return %c0_i32, %arg0 : i32, i32
  }
}

</mosaic_0001>

<bundles_post_ra>
// kernel: sparse_sum_pooling.1
= control target key start
LH: loop header
LB: loop body
LE: loop exit
PB: predicated region body
PF: predicated region fallthrough
CT: control target
= control target key end

     0   :  { %7 = vsyncpa [#allocation4], 0  ;;  %s265_s0 = inlined_call_operand.vmem [shape: s32[1,16], index: 0, kind: input, shape index: {}]   ;;  %s266_s1 = inlined_call_operand.hbm [shape: f32[16,32], index: 1, kind: input, shape index: {}]   ;;  %s267_s2 = inlined_call_operand.hbm [shape: f32[3,32], index: 2, kind: output, shape index: {}]  }
   0x1   :  { %8 = vsyncpa [#allocation5], 0  ;;  %s213_s9 = smov [#allocation3]   ;;  %s165_s13 = scalar_lea.hbm %s266_s1, 256 }
   0x2   :  { %s16_s10 = sshll.u32 %s213_s9, 4  ;;  %p166_p0 = scmp.ne.s32.totalorder %s266_s1, %s165_s13  ;;  %s17_s10 = int_to_ptr.vmem [resolvable:$true] %s16_s10 }
   0x3   :  { %p169_p1 = scmp.lt.u32.totalorder %s165_s13, %s266_s1 }
   0x5   :  { %p171_p2 = pnand %p169_p1, %p166_p0 }
   0x7   :  { %174 = shalt.err (!%p171_p2)
}
   0x8   :  { %s175_s18 = scalar_lea.vmem %s17_s10, 256  ;;  %p180_p4 = scmp.lt.s32.totalorder %s17_s10, %s17_s10 }
   0x9   :  { %p176_p3 = scmp.ne.s32.totalorder %s17_s10, %s175_s18  ;;  %p181_p5 = scmp.lt.s32.totalorder %s175_s18, %s175_s18 }
   0xb   :  { %p182_p6 = por %p181_p5, %p180_p4 }
   0xd   :  { %p183_p7 = pnand %p182_p6, %p176_p3 }
   0xf   :  { %186 = shalt.err (!%p183_p7)
}
  0x10   :  { %s214_s19 = smov 128   ;;  %s215_s20 = smov 8  }
  0x11   :  { %22 = dma.hbm_to_vmem [thread:$0]  %s266_s1, 256, %s17_s10, [#allocation4], %s214_s19, %s214_s19, %s215_s20  }
  0x12   :  { %209 = dma.done.wait [#allocation4], 256  }
  0x13   :  { %210 = vsyncadd [#allocation4], 4294967040  ;;  %vm30_vm0 = vcmask 256000   ;;  %v216_v0 = vmov 0.0|0.0   ;;  %v217_v1 = vmov 0.0   ;;  %vm218_vm1 = vmmov 0  }
  0x14   :  { %155 = vmatprep.subr.bf16.mxu0 %v216_v0  ;;  %31 = vst.msk [vmem:[#allocation2] sm:$0x7] %vm30_vm0, %v217_v1  ;;  %152 = vmatprep.mubr.msk.f32.mxu0 %vm218_vm1, %v217_v1  ;;  %v35_v2 = vlaneseq  ;;  %v33_v4 = vld [vmem:[#allocation3] sm:$0xff]  ;;  %v34_v5 = vld [vmem:[#allocation3 + $0x8] sm:$0xff]  ;;  %v142_v6 = vld [vmem:[%s265_s0] ss:$0 sm:$0xff] }
  0x15   :  { %v156_v7 = vpack.c.bf16 %v34_v5, %v33_v4  ;;  %vm45_vm3 = vcmask 130048   ;;  %s219_s1 = smov [#allocation6]  }
  0x16   :  { %v36_v3 = vshrl.u32 %v35_v2, 7  ;;  %s133_s25 = sshll.u32 %s219_s1, 4  ;;  %s134_s25 = int_to_ptr.vmem [resolvable:$true] %s133_s25 }
  0x17   :  { %157 = vmatpush3.bf16.msra.mxu0 %v156_v7  ;;  %s187_s26 = scalar_lea.vmem %s134_s25, 64  ;;  %p192_p9 = scmp.lt.s32.totalorder %s134_s25, %s134_s25 }
  0x18   :  { %vm41_vm2 = vcmp.eq.s32.totalorder %v142_v6, %v36_v3  ;;  %p188_p8 = scmp.ne.s32.totalorder %s134_s25, %s187_s26  ;;  %p193_p10 = scmp.lt.s32.totalorder %s187_s26, %s187_s26 }
  0x19   :  { %v143_v8 = vsel %vm41_vm2, 1.0, %v217_v1 }
  0x1a   :  { %153 = vmatmul.mubr.msk.f32.vlgmr.msra.gmra.mrb[0].mxu0 %vm45_vm3, %v143_v8  ;;  %p194_p11 = por %p193_p10, %p192_p9 }
  0x1b   :  { %v44_v9 = vld [vmem:[#allocation2] sm:$0x7] }
  0x1c   :  { %p195_p12 = pnand %p194_p11, %p188_p8 }
  0xed   :  { %v115_v10 = vpop.f32.mrb[0].mxu0 }
  0xee   :  { %v119_v11 = vadd.f32 %v115_v10, %v44_v9  ;;  %v154_v12 = vpop.f32.mrb[1].mxu0 }
  0xf0   :  { %121 = vst.msk [vmem:[#allocation2] sm:$0x7] %vm30_vm0, %v119_v11 }
  0xf7   :  { %v125_v13 = vld [vmem:[#allocation2] sm:$0x7] }
  0xf8   :  { %126 = vst.msk [vmem:[#allocation6] sm:$0x7] %vm30_vm0, %v125_v13 }
  0xf9   :  { %198 = shalt.err (!%p195_p12)
}
  0xfa   :  { %s199_s28 = scalar_lea.hbm %s267_s2, 64 }
  0xfb   :  { %p200_p13 = scmp.ne.s32.totalorder %s267_s2, %s199_s28  ;;  %p203_p0 = scmp.lt.u32.totalorder %s199_s28, %s267_s2 }
  0xfd   :  { %p205_p1 = pnand %p203_p0, %p200_p13 }
  0xff   :  { %208 = shalt.err (!%p205_p1)
}
 0x100   :  { %136 = dma.vmem_to_hbm [thread:$0]  %s134_s25, 64, %s267_s2, [#allocation5]  }
 0x101   :  { %211 = dma.done.wait [#allocation5], 64  }
 0x102   :  { %212 = vsyncadd [#allocation5], 4294967232 }
 0x103   :  { %140 = vsyncpa [#allocation4], 1 }
 0x104   :  { %141 = vsyncpa [#allocation5], 1 }

</bundles_post_ra>
